<compile_context>
chip_gen: v7x
topology: tpu7x:2x2x1
jax: 0.10.0
libtpu: 0.0.40
codegen_flags: <defaults>
</compile_context>

<pallas_src>
import math

import jax
import jax.numpy as jnp
from jax.experimental import pallas as pl
from jax.experimental.pallas import tpu as pltpu


def _rup(n, m):
    return ((n + m - 1) // m) * m


def _choose_tile(n):
    """Pad node count to a sublane/tile-friendly size and pick a square tile."""
    base = 256
    n_pad = _rup(n, 8)
    if n_pad >= base:
        return _rup(n, base), base
    return n_pad, n_pad


# -------- kernel 1: s1 = (mean_t(x) @ Wm + bm) @ W1, tiled over node rows --------
def features_kernel(xp_ref, wm_ref, bm_ref, w1_ref, s1_ref):
    # Backbone stand-in (linear projection) on the time-averaged series, fused
    # with the GCN1 "support" matmul.  bf16 MXU operands, f32 accumulation.
    h = jnp.dot(xp_ref[...], wm_ref[...],
                preferred_element_type=jnp.float32) + bm_ref[...]
    s1_ref[...] = jnp.dot(h.astype(w1_ref.dtype), w1_ref[...],
                          preferred_element_type=jnp.float32).astype(s1_ref.dtype)


# -------- kernel 2: z1 = A @ s1 + b1 ; h1 = relu(z1) ; s2 = h1 @ W2 --------
def gcn1_kernel(tmask_ref, a_ref, s1_ref, b1_ref, w2_ref, s2_ref, acc_ref):
    i = pl.program_id(0)
    j = pl.program_id(1)

    @pl.when(j == 0)
    def _init():
        acc_ref[...] = jnp.zeros_like(acc_ref)

    # K-NN adjacency is sparse: skip MXU work for all-zero A tiles.
    @pl.when(tmask_ref[i, j] != 0)
    def _acc():
        acc_ref[...] += jnp.dot(a_ref[...], s1_ref[...],
                                preferred_element_type=jnp.float32)

    @pl.when(j == pl.num_programs(1) - 1)
    def _fin():
        h1 = jnp.maximum(acc_ref[...] + b1_ref[...], 0.0)   # ReLU, f32 epilogue
        # F.dropout(..., training=self.training): identity in eval/inference.
        s2_ref[...] = jnp.dot(h1.astype(w2_ref.dtype), w2_ref[...],
                              preferred_element_type=jnp.float32).astype(s2_ref.dtype)


# -------- kernel 3: z2 = A @ s2 + b2 ; log_softmax over the class lanes --------
def gcn2_kernel(tmask_ref, a_ref, s2_ref, b2_ref, o_ref, acc_ref):
    i = pl.program_id(0)
    j = pl.program_id(1)

    @pl.when(j == 0)
    def _init():
        acc_ref[...] = jnp.zeros_like(acc_ref)

    @pl.when(tmask_ref[i, j] != 0)
    def _acc():
        acc_ref[...] += jnp.dot(a_ref[...], s2_ref[...],
                                preferred_element_type=jnp.float32)

    @pl.when(j == pl.num_programs(1) - 1)
    def _fin():
        # Padded class columns carry a -1e9 bias -> they vanish from the softmax.
        z2 = acc_ref[...] + b2_ref[...]
        m = jnp.max(z2, axis=1, keepdims=True)
        e = jnp.exp(z2 - m)
        lse = jnp.log(jnp.sum(e, axis=1, keepdims=True)) + m
        o_ref[...] = z2 - lse


def build_knn_adj(adj, K, alpha):
    """Densified version of SimTSC.forward's sparse K-NN adjacency.

    ranks = argsort(adj, dim=1) ascending; K smallest entries per row get
    value 1/exp(alpha*d), then each row is normalized to sum 1.
    (As in the original, the zero diagonal keeps each node in its own K-NN set.)
    """
    N = adj.shape[0]
    idx = jnp.argsort(adj, axis=1)[:, :K]
    vals = jnp.exp(-alpha * jnp.take_along_axis(adj, idx, axis=1))
    vals = vals / jnp.sum(vals, axis=1, keepdims=True)
    dense = jnp.zeros((N, N), jnp.float32)
    dense = dense.at[jnp.arange(N)[:, None], idx].set(vals.astype(jnp.float32))
    return dense


def init_params(key, input_size, n_feature_maps, nb_classes):
    ks = jax.random.split(key, 6)
    # Backbone stand-in projection (deterministic).
    # TODO(synk): the dp-Mamba `Model(self.args1)` backbone is not provided in
    # the source; a per-timestep linear projection stands in for it.
    wm = jax.random.normal(ks[0], (input_size, n_feature_maps), jnp.float32) * 0.1
    bm = jax.random.normal(ks[1], (1, n_feature_maps), jnp.float32) * 0.1
    # GraphConvolution.reset_parameters: uniform(-stdv, stdv), stdv = 1/sqrt(in_features)
    stdv = 1.0 / math.sqrt(n_feature_maps)
    w1 = jax.random.uniform(ks[2], (n_feature_maps, n_feature_maps), jnp.float32, -stdv, stdv)
    b1 = jax.random.uniform(ks[3], (1, n_feature_maps), jnp.float32, -stdv, stdv)
    w2 = jax.random.uniform(ks[4], (n_feature_maps, nb_classes), jnp.float32, -stdv, stdv)
    b2 = jax.random.uniform(ks[5], (1, nb_classes), jnp.float32, -stdv, stdv)
    return wm, bm, w1, b1, w2, b2


def simtsc_forward(x, adj, K, alpha, params):
    """x: (N, C, L) float32, adj: (N, N) float32 distance matrix."""
    N, C, L = x.shape
    wm, bm, w1, b1, w2, b2 = params
    F_ = wm.shape[1]
    nb_classes = w2.shape[1]

    # ---- glue: sparse K-NN adjacency (densified, row-normalized) ----
    a_dense = build_knn_adj(adj.astype(jnp.float32), K, alpha)           # (N, N)

    # graphtrans / self.linear1 edge-weight path feeds only the kangin branch
    # (num_layers == 1); it is dead code for the num_layers == 2 GCN path.

    # ---- glue: x.permute(0,2,1) -> backbone -> permute -> avg_pool1d over L.
    # The time-average commutes with the linear backbone stand-in, so pool first:
    # mean_t(x @ Wm + bm) == (mean_t x) @ Wm + bm.
    # TODO(synk): if a non-linear dp-Mamba backbone is plugged in, the pooling
    # must move back after the backbone (reshape to (N, L, F) + mean(axis=1)).
    x_pool = jnp.mean(x.astype(jnp.float32), axis=2)                      # (N, C)

    # ---- padding to lane/sublane-friendly shapes ----
    CP = _rup(C, 128)
    FP = _rup(F_, 128)
    KP = _rup(nb_classes, 128)
    Np, T = _choose_tile(N)
    nr = Np // T
    nc = Np // T

    xp = jnp.zeros((Np, CP), jnp.float32).at[:N, :C].set(x_pool).astype(jnp.bfloat16)
    wm_p = jnp.zeros((CP, FP), jnp.float32).at[:C, :F_].set(wm).astype(jnp.bfloat16)
    bm_p = jnp.zeros((1, FP), jnp.float32).at[:, :F_].set(bm)
    w1_p = jnp.zeros((FP, FP), jnp.float32).at[:F_, :F_].set(w1).astype(jnp.bfloat16)
    b1_p = jnp.zeros((1, FP), jnp.float32).at[:, :F_].set(b1)
    w2_p = jnp.zeros((FP, KP), jnp.float32).at[:F_, :nb_classes].set(w2).astype(jnp.bfloat16)
    b2_p = jnp.full((1, KP), -1e9, jnp.float32).at[:, :nb_classes].set(b2)

    a_pad = jnp.zeros((Np, Np), jnp.float32).at[:N, :N].set(a_dense)
    # Per-tile nonzero flags (scalar-prefetched) -> skip all-zero A tiles in-kernel.
    tile_mask = jnp.any(a_pad.reshape(nr, T, nc, T) != 0.0, axis=(1, 3)).astype(jnp.int32)
    a_bf = a_pad.astype(jnp.bfloat16)

    vmem_bytes = 32 * 1024 * 1024
    cparams_1d = pltpu.CompilerParams(
        dimension_semantics=("parallel",), vmem_limit_bytes=vmem_bytes)
    cparams_2d = pltpu.CompilerParams(
        dimension_semantics=("parallel", "arbitrary"), vmem_limit_bytes=vmem_bytes)

    # ---- kernel 1: per-node projection + GCN1 support, tiled over node rows ----
    s1 = pl.pallas_call(
        features_kernel,
        out_shape=jax.ShapeDtypeStruct((Np, FP), jnp.bfloat16),
        grid=(nr,),
        in_specs=[
            pl.BlockSpec((T, CP), lambda i: (i, 0)),
            pl.BlockSpec((CP, FP), lambda i: (0, 0)),
            pl.BlockSpec((1, FP), lambda i: (0, 0)),
            pl.BlockSpec((FP, FP), lambda i: (0, 0)),
        ],
        out_specs=pl.BlockSpec((T, FP), lambda i: (i, 0)),
        compiler_params=cparams_1d,
    )(xp, wm_p, bm_p, w1_p)

    # ---- kernel 2: h1 = relu(A @ s1 + b1); s2 = h1 @ W2 (class support) ----
    s2 = pl.pallas_call(
        gcn1_kernel,
        out_shape=jax.ShapeDtypeStruct((Np, KP), jnp.bfloat16),
        grid_spec=pltpu.PrefetchScalarGridSpec(
            num_scalar_prefetch=1,
            grid=(nr, nc),
            in_specs=[
                pl.BlockSpec((T, T), lambda i, j, tmsk: (i, j)),
                pl.BlockSpec((T, FP), lambda i, j, tmsk: (j, 0)),
                pl.BlockSpec((1, FP), lambda i, j, tmsk: (0, 0)),
                pl.BlockSpec((FP, KP), lambda i, j, tmsk: (0, 0)),
            ],
            out_specs=pl.BlockSpec((T, KP), lambda i, j, tmsk: (i, 0)),
            scratch_shapes=[pltpu.VMEM((T, FP), jnp.float32)],
        ),
        compiler_params=cparams_2d,
    )(tile_mask, a_bf, s1, b1_p, w2_p)

    # ---- kernel 3: z2 = A @ s2 + b2; log_softmax over the class lanes ----
    out_p = pl.pallas_call(
        gcn2_kernel,
        out_shape=jax.ShapeDtypeStruct((Np, KP), jnp.float32),
        grid_spec=pltpu.PrefetchScalarGridSpec(
            num_scalar_prefetch=1,
            grid=(nr, nc),
            in_specs=[
                pl.BlockSpec((T, T), lambda i, j, tmsk: (i, j)),
                pl.BlockSpec((T, KP), lambda i, j, tmsk: (j, 0)),
                pl.BlockSpec((1, KP), lambda i, j, tmsk: (0, 0)),
            ],
            out_specs=pl.BlockSpec((T, KP), lambda i, j, tmsk: (i, 0)),
            scratch_shapes=[pltpu.VMEM((T, KP), jnp.float32)],
        ),
        compiler_params=cparams_2d,
    )(tile_mask, a_bf, s2, b2_p)

    return out_p[:N, :nb_classes]


if __name__ == "__main__":
    key = jax.random.PRNGKey(0)
    N, C, L = 8, 4, 16            # N graph nodes (time series), C channels, L timesteps
    n_feature_maps = 128
    nb_classes = 8
    K_nn = 3
    alpha = 0.3

    kx, ka, kp = jax.random.split(key, 3)
    x = jax.random.normal(kx, (N, C, L), jnp.float32)
    d = jax.random.uniform(ka, (N, N), jnp.float32)
    adj = (d + d.T) * 0.5 * (1.0 - jnp.eye(N, dtype=jnp.float32))  # symmetric distances, zero diag

    params = init_params(kp, C, n_feature_maps, nb_classes)

    out = simtsc_forward(x, adj, K_nn, alpha, params)
    jax.block_until_ready(out)
    assert out.shape == (N, nb_classes)
    assert bool(jnp.all(jnp.isfinite(out)))
    print("KERNEL_OK")
</pallas_src>

<mosaic_0001>
module attributes {stable_mosaic.version = 11 : i64} {
  func.func @features_kernel(%arg0: i32, %arg1: memref<8x128xbf16, #tpu.memory_space<vmem>>, %arg2: memref<128x128xbf16, #tpu.memory_space<vmem>>, %arg3: memref<1x128xf32, #tpu.memory_space<vmem>>, %arg4: memref<128x128xbf16, #tpu.memory_space<vmem>>, %arg5: memref<8x128xbf16, #tpu.memory_space<vmem>>) attributes {dimension_semantics = [#tpu.dimension_semantics<parallel>], iteration_bounds = array<i64: 1>, scalar_prefetch = 0 : i64, scratch_operands = 0 : i64, tpu.core_type = #tpu.core_type<tc>, window_params = [{transform_indices = @transform_0, window_bounds = array<i64: 8, 128>}, {pipeline_mode = #tpu.pipeline_mode<synchronous>, transform_indices = @transform_1, window_bounds = array<i64: 128, 128>}, {pipeline_mode = #tpu.pipeline_mode<synchronous>, transform_indices = @transform_2, window_bounds = array<i64: 1, 128>}, {pipeline_mode = #tpu.pipeline_mode<synchronous>, transform_indices = @transform_3, window_bounds = array<i64: 128, 128>}, {transform_indices = @transform_4, window_bounds = array<i64: 8, 128>}]} {
    %c0 = arith.constant 0 : index
    %c0_0 = arith.constant 0 : index
    %0 = vector.load %arg1[%c0, %c0_0] : memref<8x128xbf16, #tpu.memory_space<vmem>>, vector<8x128xbf16>
    %c0_1 = arith.constant 0 : index
    %c0_2 = arith.constant 0 : index
    %1 = vector.load %arg2[%c0_1, %c0_2] : memref<128x128xbf16, #tpu.memory_space<vmem>>, vector<128x128xbf16>
    %cst = arith.constant dense<0.000000e+00> : vector<8x128xf32>
    %2 = tpu.matmul %0, %1, %cst {dimension_numbers = #tpu.dot_dimension_numbers<[1], [0], [0], [1], [0, 0, 1, 1], [], []>} : vector<8x128xbf16>, vector<128x128xbf16>, vector<8x128xf32> -> vector<8x128xf32>
    %c0_3 = arith.constant 0 : index
    %c0_4 = arith.constant 0 : index
    %3 = vector.load %arg3[%c0_3, %c0_4] : memref<1x128xf32, #tpu.memory_space<vmem>>, vector<1x128xf32>
    %4 = vector.broadcast %3 : vector<1x128xf32> to vector<8x128xf32>
    %5 = arith.addf %2, %4 : vector<8x128xf32>
    %6 = arith.truncf %5 : vector<8x128xf32> to vector<8x128xbf16>
    %c0_5 = arith.constant 0 : index
    %c0_6 = arith.constant 0 : index
    %7 = vector.load %arg4[%c0_5, %c0_6] : memref<128x128xbf16, #tpu.memory_space<vmem>>, vector<128x128xbf16>
    %cst_7 = arith.constant dense<0.000000e+00> : vector<8x128xf32>
    %8 = tpu.matmul %6, %7, %cst_7 {dimension_numbers = #tpu.dot_dimension_numbers<[1], [0], [0], [1], [0, 0, 1, 1], [], []>} : vector<8x128xbf16>, vector<128x128xbf16>, vector<8x128xf32> -> vector<8x128xf32>
    %9 = arith.truncf %8 : vector<8x128xf32> to vector<8x128xbf16>
    %c0_8 = arith.constant 0 : index
    %c0_9 = arith.constant 0 : index
    %10 = vector.load %arg5[%c0_8, %c0_9] : memref<8x128xbf16, #tpu.memory_space<vmem>>, vector<8x128xbf16>
    tpu.vector_store %arg5[%c0_8, %c0_9], %9 {strides = array<i32>} : memref<8x128xbf16, #tpu.memory_space<vmem>>, vector<8x128xbf16>,
    return
  }
  func.func @transform_0(%arg0: i32) -> (i32, i32) {
    %c0_i32 = arith.constant 0 : i32
    %c0_i32_0 = arith.constant 0 : i32
    return %arg0, %c0_i32 : i32, i32
  }
  func.func @transform_1(%arg0: i32) -> (i32, i32) {
    %c0_i32 = arith.constant 0 : i32
    %c0_i32_0 = arith.constant 0 : i32
    %c0_i32_1 = arith.constant 0 : i32
    return %c0_i32, %c0_i32_0 : i32, i32
  }
  func.func @transform_2(%arg0: i32) -> (i32, i32) {
    %c0_i32 = arith.constant 0 : i32
    %c0_i32_0 = arith.constant 0 : i32
    %c0_i32_1 = arith.constant 0 : i32
    return %c0_i32, %c0_i32_0 : i32, i32
  }
  func.func @transform_3(%arg0: i32) -> (i32, i32) {
    %c0_i32 = arith.constant 0 : i32
    %c0_i32_0 = arith.constant 0 : i32
    %c0_i32_1 = arith.constant 0 : i32
    return %c0_i32, %c0_i32_0 : i32, i32
  }
  func.func @transform_4(%arg0: i32) -> (i32, i32) {
    %c0_i32 = arith.constant 0 : i32
    %c0_i32_0 = arith.constant 0 : i32
    return %arg0, %c0_i32 : i32, i32
  }
}

</mosaic_0001>

<bundles_post_ra>
// kernel: tpu_custom_call.1
= control target key start
LH: loop header
LB: loop body
LE: loop exit
PB: predicated region body
PF: predicated region fallthrough
CT: control target
= control target key end

     0   :  { %9 = vsyncpa [#allocation3], 0  ;;  %s576_s0 = inlined_call_operand.hbm [shape: bf16[8,128], index: 0, kind: input, shape index: {}]   ;;  %s577_s1 = inlined_call_operand.hbm [shape: bf16[128,128], index: 1, kind: input, shape index: {}]   ;;  %s578_s2 = inlined_call_operand.vmem [shape: f32[1,128], index: 2, kind: input, shape index: {}]   ;;  %s579_s3 = inlined_call_operand.hbm [shape: bf16[128,128], index: 3, kind: input, shape index: {}]   ;;  %s580_s4 = inlined_call_operand.hbm [shape: bf16[8,128], index: 4, kind: output, shape index: {}]  }
   0x1   :  { %10 = vsyncpa [#allocation6], 0 }
   0x2   :  { %11 = vsyncpa [#allocation4], 0  ;;  %s486_s15 = smov [#allocation5]   ;;  %s392_s19 = scalar_lea.hbm %s577_s1, 1024 }
   0x3   :  { %s27_s16 = sshll.u32 %s486_s15, 4  ;;  %p393_p0 = scmp.ne.s32.totalorder %s577_s1, %s392_s19  ;;  %s28_s16 = int_to_ptr.vmem [resolvable:$true] %s27_s16 }
   0x4   :  { %p396_p1 = scmp.lt.u32.totalorder %s392_s19, %s577_s1 }
   0x6   :  { %p398_p2 = pnand %p396_p1, %p393_p0 }
   0x8   :  { %401 = shalt.err (!%p398_p2)
}
   0x9   :  { %s402_s24 = scalar_lea.vmem %s28_s16, 1024  ;;  %p407_p4 = scmp.lt.s32.totalorder %s28_s16, %s28_s16 }
   0xa   :  { %p403_p3 = scmp.ne.s32.totalorder %s28_s16, %s402_s24  ;;  %p408_p5 = scmp.lt.s32.totalorder %s402_s24, %s402_s24 }
   0xc   :  { %p409_p6 = por %p408_p5, %p407_p4 }
   0xe   :  { %p410_p7 = pnand %p409_p6, %p403_p3 }
  0x10   :  { %413 = shalt.err (!%p410_p7)
}
  0x11   :  { %s487_s25 = smov 64   ;;  %s488_s26 = smov 4  }
  0x12   :  { %33 = dma.hbm_to_vmem [thread:$0]  %s577_s1, 1024, %s28_s16, [#allocation6], %s487_s25, %s487_s25, %s488_s26  }
  0x13   :  { %s489_s29 = smov [#allocation2]   ;;  %s490_s5 = smov [#allocation7]  }
  0x14   :  { %s18_s30 = sshll.u32 %s489_s29, 4  ;;  %s41_s6 = sshll.u32 %s490_s5, 4  ;;  %s19_s30 = int_to_ptr.vmem [resolvable:$true] %s18_s30  ;;  %s42_s6 = int_to_ptr.vmem [resolvable:$true] %s41_s6 }
  0x15   :  { %s414_s9 = scalar_lea.hbm %s576_s0, 64 }
  0x16   :  { %p415_p8 = scmp.ne.s32.totalorder %s576_s0, %s414_s9  ;;  %p418_p9 = scmp.lt.u32.totalorder %s414_s9, %s576_s0 }
  0x18   :  { %p420_p10 = pnand %p418_p9, %p415_p8 }
  0x1a   :  { %423 = shalt.err (!%p420_p10)
}
  0x1b   :  { %s424_s1 = scalar_lea.vmem %s19_s30, 64  ;;  %p429_p12 = scmp.lt.s32.totalorder %s19_s30, %s19_s30 }
  0x1c   :  { %p425_p11 = scmp.ne.s32.totalorder %s19_s30, %s424_s1  ;;  %p430_p13 = scmp.lt.s32.totalorder %s424_s1, %s424_s1 }
  0x1e   :  { %p431_p0 = por %p430_p13, %p429_p12 }
  0x20   :  { %p432_p1 = pnand %p431_p0, %p425_p11 }
  0x22   :  { %435 = shalt.err (!%p432_p1)
}
  0x23   :  { %21 = dma.hbm_to_vmem [thread:$0]  %s576_s0, 64, %s19_s30, [#allocation3]  }
  0x24   :  { %s436_s18 = scalar_lea.hbm %s579_s3, 1024 }
  0x25   :  { %p437_p2 = scmp.ne.s32.totalorder %s579_s3, %s436_s18  ;;  %p440_p3 = scmp.lt.u32.totalorder %s436_s18, %s579_s3 }
  0x27   :  { %p442_p4 = pnand %p440_p3, %p437_p2 }
  0x29   :  { %445 = shalt.err (!%p442_p4)
}
  0x2a   :  { %s446_s23 = scalar_lea.vmem %s42_s6, 1024  ;;  %p451_p6 = scmp.lt.s32.totalorder %s42_s6, %s42_s6 }
  0x2b   :  { %p447_p5 = scmp.ne.s32.totalorder %s42_s6, %s446_s23  ;;  %p452_p7 = scmp.lt.s32.totalorder %s446_s23, %s446_s23 }
  0x2d   :  { %p453_p8 = por %p452_p7, %p451_p6 }
  0x2f   :  { %p454_p9 = pnand %p453_p8, %p447_p5 }
  0x31   :  { %457 = shalt.err (!%p454_p9)
}
  0x32   :  { %47 = dma.hbm_to_vmem [thread:$0]  %s579_s3, 1024, %s42_s6, [#allocation6], %s487_s25, %s487_s25, %s488_s26  }
  0x33   :  { %480 = dma.done.wait [#allocation3], 64  }
  0x34   :  { %481 = vsyncadd [#allocation3], 4294967232 }
  0x35   :  { %482 = dma.done.wait [#allocation6], 2048  }
  0x36   :  { %483 = vsyncadd [#allocation6], 4294965248  ;;  %v491_v0 = vmov 0.0   ;;  %vm492_vm0 = vmmov 0   ;;  %v376_v1 = vld [vmem:[#allocation5] sm:$0xff]   ;;  %v377_v2 = vld [vmem:[#allocation5 + $0x8] sm:$0xff]  }
  0x37   :  { %328 = vmatprep.subr.bf16.mxu0 %v491_v0  ;;  %344 = vmatprep.mubr.msk.bf16.mxu0 %vm492_vm0, %v491_v0  ;;  %v378_v3 = vld [vmem:[#allocation5 + $0x10] sm:$0xff]   ;;  %v384_v4 = vld [vmem:[#allocation7] sm:$0xff]   ;;  %v379_v5 = vld [vmem:[#allocation5 + $0x18] sm:$0xff]   ;;  %s493_s26 = smov [#allocation8]  }
  0x38   :  { %348 = vmatprep.subr.bf16.mxu1 %v491_v0  ;;  %364 = vmatprep.mubr.msk.bf16.mxu1 %vm492_vm0, %v491_v0  ;;  %v385_v6 = vld [vmem:[#allocation7 + $0x8] sm:$0xff]   ;;  %v380_v7 = vld [vmem:[#allocation5 + $0x20] sm:$0xff]   ;;  %v386_v8 = vld [vmem:[#allocation7 + $0x10] sm:$0xff]   ;;  %s283_s27 = sshll.u32 %s493_s26, 4  ;;  %s284_s27 = int_to_ptr.vmem [resolvable:$true] %s283_s27 }
  0x39   :  { %329 = vmatpush3.bf16.msra.mxu0 %v376_v1  ;;  %349 = vmatpush3.bf16.msra.mxu1 %v384_v4  ;;  %v381_v9 = vld [vmem:[#allocation5 + $0x28] sm:$0xff]   ;;  %v387_v10 = vld [vmem:[#allocation7 + $0x18] sm:$0xff]   ;;  %v382_v11 = vld [vmem:[#allocation5 + $0x30] sm:$0xff]   ;;  %s458_s28 = scalar_lea.vmem %s284_s27, 64  ;;  %p463_p11 = scmp.lt.s32.totalorder %s284_s27, %s284_s27 }
  0x3a   :  { %330 = vmatprep.subr.bf16.mxu0 %v491_v0  ;;  %350 = vmatprep.subr.bf16.mxu1 %v491_v0  ;;  %v388_v12 = vld [vmem:[#allocation7 + $0x20] sm:$0xff]   ;;  %v383_v13 = vld [vmem:[#allocation5 + $0x38] sm:$0xff]   ;;  %v389_v14 = vld [vmem:[#allocation7 + $0x28] sm:$0xff]   ;;  %p459_p10 = scmp.ne.s32.totalorder %s284_s27, %s458_s28  ;;  %p464_p12 = scmp.lt.s32.totalorder %s458_s28, %s458_s28 }
  0x3b   :  { %v58_v15 = vld [vmem:[#allocation2] sm:$0xf]  ;;  %v390_v16 = vld [vmem:[#allocation7 + $0x30] sm:$0xff]  }
  0x3c   :  { %v391_v17 = vld [vmem:[#allocation7 + $0x38] sm:$0xff]   ;;  %p465_p13 = por %p464_p12, %p463_p11 }
  0x3d   :  { %331 = vmatpush3.bf16.msra.mxu0 %v377_v2  ;;  %351 = vmatpush3.bf16.msra.mxu1 %v385_v6  ;;  %v293_v18 = vld [vmem:[%s578_s2] ss:$0 sm:$0xff] }
  0x3e   :  { %332 = vmatprep.subr.bf16.mxu0 %v491_v0  ;;  %352 = vmatprep.subr.bf16.mxu1 %v491_v0  ;;  %p466_p0 = pnand %p465_p13, %p459_p10 }
  0x41   :  { %333 = vmatpush3.bf16.msra.mxu0 %v378_v3  ;;  %353 = vmatpush3.bf16.msra.mxu1 %v386_v8 }
  0x42   :  { %334 = vmatprep.subr.bf16.mxu0 %v491_v0  ;;  %354 = vmatprep.subr.bf16.mxu1 %v491_v0 }
  0x45   :  { %335 = vmatpush3.bf16.msra.mxu0 %v379_v5  ;;  %355 = vmatpush3.bf16.msra.mxu1 %v387_v10 }
  0x46   :  { %336 = vmatprep.subr.bf16.mxu0 %v491_v0  ;;  %356 = vmatprep.subr.bf16.mxu1 %v491_v0 }
  0x49   :  { %337 = vmatpush3.bf16.msra.mxu0 %v380_v7  ;;  %357 = vmatpush3.bf16.msra.mxu1 %v388_v12 }
  0x4a   :  { %338 = vmatprep.subr.bf16.mxu0 %v491_v0  ;;  %358 = vmatprep.subr.bf16.mxu1 %v491_v0 }
  0x4d   :  { %339 = vmatpush3.bf16.msra.mxu0 %v381_v9  ;;  %359 = vmatpush3.bf16.msra.mxu1 %v389_v14 }
  0x4e   :  { %340 = vmatprep.subr.bf16.mxu0 %v491_v0  ;;  %360 = vmatprep.subr.bf16.mxu1 %v491_v0 }
  0x51   :  { %341 = vmatpush3.bf16.msra.mxu0 %v382_v11  ;;  %361 = vmatpush3.bf16.msra.mxu1 %v390_v16 }
  0x52   :  { %342 = vmatprep.subr.bf16.mxu0 %v491_v0  ;;  %362 = vmatprep.subr.bf16.mxu1 %v491_v0 }
  0x55   :  { %343 = vmatpush3.bf16.msra.mxu0 %v383_v13  ;;  %363 = vmatpush3.bf16.msra.mxu1 %v391_v17 }
  0x58   :  { %345 = vmatmul.mubr.bf16.vlgmr.msra.gmra.mrb[0].mxu0 %v58_v15 }
 0x12b   :  { %v164_v19 = vpop.f32.mrb[0].mxu0 }
 0x12c   :  { %v165_v20 = vadd.f32 %v293_v18, %v164_v19  ;;  %v346_v21 = vpop.f32.mrb[1].mxu0 }
 0x12d   :  { %v167_v22 = vpop.f32.mrb[2].mxu0 }
 0x12e   :  { %v170_v23 = vpack.c.bf16 %v165_v20, %v165_v20  ;;  %v347_v24 = vpop.f32.mrb[3].mxu0 }
 0x130   :  { %365 = vmatmul.mubr.bf16.vlgmr.msra.gmra.mrb[0].mxu1 %v170_v23 }
 0x203   :  { %v269_v25 = vpop.f32.mrb[0].mxu1 }
 0x204   :  { %v275_v26 = vpack.c.bf16 %v269_v25, %v269_v25  ;;  %v366_v27 = vpop.f32.mrb[1].mxu1 }
 0x205   :  { %v272_v28 = vpop.f32.mrb[2].mxu1 }
 0x206   :  { %276 = vst [vmem:[#allocation8] sm:$0xf] %v275_v26  ;;  %v367_v29 = vpop.f32.mrb[3].mxu1 }
 0x207   :  { %469 = shalt.err (!%p466_p0)
}
 0x208   :  { %s470_s30 = scalar_lea.hbm %s580_s4, 64 }
 0x209   :  { %p471_p1 = scmp.ne.s32.totalorder %s580_s4, %s470_s30  ;;  %p474_p2 = scmp.lt.u32.totalorder %s470_s30, %s580_s4 }
 0x20b   :  { %p476_p3 = pnand %p474_p2, %p471_p1 }
 0x20d   :  { %479 = shalt.err (!%p476_p3)
}
 0x20e   :  { %286 = dma.vmem_to_hbm [thread:$0]  %s284_s27, 64, %s580_s4, [#allocation4]  }
 0x20f   :  { %484 = dma.done.wait [#allocation4], 64  }
 0x210   :  { %485 = vsyncadd [#allocation4], 4294967232 }
 0x211   :  { %290 = vsyncpa [#allocation3], 1 }
 0x212   :  { %291 = vsyncpa [#allocation6], 1 }
 0x213   :  { %292 = vsyncpa [#allocation4], 1 }

</bundles_post_ra>
